<compile_context>
chip_gen: v7x
topology: tpu7x:2x2x1
jax: 0.10.0
libtpu: 0.0.40
codegen_flags: <defaults>
</compile_context>

<pallas_src>
import jax
import jax.numpy as jnp
from jax import lax
from jax.experimental import pallas as pl
from jax.experimental.pallas import tpu as pltpu

EPSILON = 1e-6


def _round_up(x, m):
    return (x + m - 1) // m * m


def _cdiv(a, b):
    return (a + b - 1) // b


def _make_kernel(M, N, tile_m, blk_n, apply_sigmoid, need_row_mask, need_col_mask):
    """Grid: (row_tiles [parallel], k reduction over columns [arbitrary]).

    Per step: sigmoid + products + single lane (XLU) reduction to (tile_m, 1)
    partials, accumulated straight into the VMEM-resident output block.
    """

    def kernel(x_ref, t_ref, o_ref):
        i = pl.program_id(0)
        k = pl.program_id(1)

        x = x_ref[...].astype(jnp.float32)
        p = jax.nn.sigmoid(x) if apply_sigmoid else x
        t = t_ref[...].astype(jnp.float32)  # target.float() in the reference

        pt = p * t
        den = p * p + t * t  # fused pp + tt (epilogue only ever uses the sum)

        # In-kernel masking of the ragged tail (replaces the jnp.pad HBM copy).
        valid = None
        if need_row_mask:
            rows = lax.broadcasted_iota(jnp.int32, (tile_m, blk_n), 0)
            valid = (i * tile_m + rows) < M
        if need_col_mask:
            cols = lax.broadcasted_iota(jnp.int32, (tile_m, blk_n), 1)
            cmask = (k * blk_n + cols) < N
            valid = cmask if valid is None else (valid & cmask)
        if valid is not None:
            pt = jnp.where(valid, pt, 0.0)
            den = jnp.where(valid, den, 0.0)

        pt_s = jnp.sum(pt, axis=-1, keepdims=True)    # (tile_m, 1)
        den_s = jnp.sum(den, axis=-1, keepdims=True)  # (tile_m, 1)

        # Accumulate directly into the output block (resident across the k axis).
        @pl.when(k == 0)
        def _():
            o_ref[:, 0:1] = pt_s
            o_ref[:, 1:2] = den_s

        @pl.when(k > 0)
        def _():
            o_ref[:, 0:1] += pt_s
            o_ref[:, 1:2] += den_s

    return kernel


def dice_loss(x_nchw, target_nchw, weight=None, *, normalization="sigmoid",
              tile_n=32768, tile_bytes=2 << 20, vmem_limit_bytes=None):
    """Forward pass of _AbstractDiceLoss.

    x_nchw, target_nchw: (B, C, H, W) arrays (logits / targets).
    weight: optional (C,) array (module default None -> no weighting).
    normalization: 'sigmoid' (default) or 'none'.
    tile_n: lane-axis block cap (multiple of 128).
    tile_bytes: per-step byte target per input block (sizes tile_m).
    Returns a scalar float32 loss.
    """
    assert normalization in ("sigmoid", "none"), normalization
    assert tile_n % 128 == 0, "tile_n must be a multiple of 128"

    B, C, H, W = x_nchw.shape
    M = B * C
    N = H * W

    # Flatten with NO transpose: (B, C, H, W) -> (B*C, H*W) is a free reshape;
    # batch is folded back into channels in the tiny JAX epilogue.
    x2 = x_nchw.reshape(M, N)
    t2 = target_nchw.reshape(M, N)

    itemsize = jnp.dtype(x2.dtype).itemsize
    sub = 8 if itemsize >= 4 else (16 if itemsize == 2 else 32)

    # Column block: full extent when it fits (no column mask), else a 128-multiple
    # cap with an in-kernel mask on the ragged last block.
    if N <= tile_n:
        blk_n = N
    else:
        blk_n = tile_n

    # Row tile from the per-step byte target, multiple of the sublane group,
    # never exceeding the row extent.
    rows_target = max(1, tile_bytes // max(1, blk_n * itemsize))
    if M <= sub:
        tile_m = M                                   # full-extent row block
    else:
        tile_m = min(_round_up(rows_target, sub), (M // sub) * sub)
        tile_m = max(tile_m, sub)

    n_row_tiles = _cdiv(M, tile_m)
    n_k = _cdiv(N, blk_n)
    grid = (n_row_tiles, n_k)

    need_row_mask = (M % tile_m) != 0
    need_col_mask = (N % blk_n) != 0

    M_out = n_row_tiles * tile_m  # output rows (padded rows are sliced off below)

    kernel = _make_kernel(M, N, tile_m, blk_n, normalization == "sigmoid",
                          need_row_mask, need_col_mask)

    if vmem_limit_bytes is None:
        vmem_limit_bytes = 32 << 20  # headroom for double-buffered input tiles

    out = pl.pallas_call(
        kernel,
        out_shape=jax.ShapeDtypeStruct((M_out, 2), jnp.float32),
        grid_spec=pltpu.PrefetchScalarGridSpec(
            num_scalar_prefetch=0,
            grid=grid,
            in_specs=[
                pl.BlockSpec((tile_m, blk_n), lambda i, k: (i, k)),  # logits
                pl.BlockSpec((tile_m, blk_n), lambda i, k: (i, k)),  # targets
            ],
            out_specs=pl.BlockSpec((tile_m, 2), lambda i, k: (i, 0)),
        ),
        compiler_params=pltpu.CompilerParams(
            dimension_semantics=("parallel", "arbitrary"),
            vmem_limit_bytes=vmem_limit_bytes,
        ),
    )(x2, t2)

    # Tiny JAX epilogue: drop padded rows, fold batch -> channel, apply optional
    # per-channel weight, clamp, and take 1 - mean.
    pt = out[:M, 0].reshape(B, C).sum(axis=0)
    den = out[:M, 1].reshape(B, C).sum(axis=0)

    intersect = pt
    if weight is not None:
        intersect = jnp.asarray(weight, jnp.float32) * intersect
    per_channel_dice = 2.0 * intersect / jnp.maximum(den, EPSILON)
    return 1.0 - jnp.mean(per_channel_dice)


def _dice_loss_ref(x_nchw, target_nchw, weight=None):
    """Pure-JAX reference mirroring the PyTorch semantics."""
    B, C, H, W = x_nchw.shape
    p = jax.nn.sigmoid(x_nchw.astype(jnp.float32))
    p = jnp.transpose(p, (1, 0, 2, 3)).reshape(C, -1)
    t = jnp.transpose(target_nchw.astype(jnp.float32), (1, 0, 2, 3)).reshape(C, -1)
    intersect = jnp.sum(p * t, axis=-1)
    if weight is not None:
        intersect = jnp.asarray(weight, jnp.float32) * intersect
    denom = jnp.sum(p * p, axis=-1) + jnp.sum(t * t, axis=-1)
    per_channel_dice = 2.0 * intersect / jnp.maximum(denom, EPSILON)
    return 1.0 - jnp.mean(per_channel_dice)


if __name__ == "__main__":
    key = jax.random.PRNGKey(0)
    kx, kt, kx2, kt2 = jax.random.split(key, 4)

    # Primary shape consistent with the module (segmentation-style NCHW).
    B, C, H, W = 2, 4, 16, 16
    x = jax.random.normal(kx, (B, C, H, W), jnp.float32)
    target = (jax.random.uniform(kt, (B, C, H, W)) > 0.5).astype(jnp.float32)

    loss = jax.block_until_ready(dice_loss(x, target, weight=None))
    ref = _dice_loss_ref(x, target, weight=None)
    assert jnp.allclose(loss, ref, atol=1e-5, rtol=1e-5), (loss, ref)

    # Odd shape exercising the ragged (non-128 / non-8) path, plus an explicit
    # per-channel weight buffer.
    B2, C2, H2, W2 = 2, 3, 10, 13
    x_b = jax.random.normal(kx2, (B2, C2, H2, W2), jnp.float32)
    t_b = (jax.random.uniform(kt2, (B2, C2, H2, W2)) > 0.5).astype(jnp.float32)
    w_b = jnp.array([0.5, 1.0, 2.0], jnp.float32)

    loss_b = jax.block_until_ready(dice_loss(x_b, t_b, weight=w_b))
    ref_b = _dice_loss_ref(x_b, t_b, weight=w_b)
    assert jnp.allclose(loss_b, ref_b, atol=1e-5, rtol=1e-5), (loss_b, ref_b)

    # Larger shape forcing multiple k steps and multiple row tiles (in-kernel
    # accumulation path and tile_m auto-sizing).
    B3, C3, H3, W3 = 4, 4, 192, 200
    kx3, kt3 = jax.random.split(kx2)
    x_c = jax.random.normal(kx3, (B3, C3, H3, W3), jnp.float32)
    t_c = (jax.random.uniform(kt3, (B3, C3, H3, W3)) > 0.5).astype(jnp.float32)
    loss_c = jax.block_until_ready(dice_loss(x_c, t_c, tile_n=4096, tile_bytes=1 << 18))
    ref_c = _dice_loss_ref(x_c, t_c)
    assert jnp.allclose(loss_c, ref_c, atol=1e-5, rtol=1e-5), (loss_c, ref_c)

    print("KERNEL_OK")
</pallas_src>

<mosaic_0001>
module attributes {stable_mosaic.version = 11 : i64} {
  func.func @kernel(%arg0: i32, %arg1: i32, %arg2: memref<8x256xf32, #tpu.memory_space<vmem>>, %arg3: memref<8x256xf32, #tpu.memory_space<vmem>>, %arg4: memref<8x2xf32, #tpu.memory_space<vmem>>) attributes {dimension_semantics = [#tpu.dimension_semantics<parallel>, #tpu.dimension_semantics<arbitrary>], iteration_bounds = array<i64: 1, 1>, scalar_prefetch = 0 : i64, scratch_operands = 0 : i64, tpu.core_type = #tpu.core_type<tc>, window_params = [{transform_indices = @transform_0, window_bounds = array<i64: 8, 256>}, {transform_indices = @transform_1, window_bounds = array<i64: 8, 256>}, {transform_indices = @transform_2, window_bounds = array<i64: 8, 2>}]} {
    %c0 = arith.constant 0 : index
    %c0_0 = arith.constant 0 : index
    %0 = vector.load %arg2[%c0, %c0_0] : memref<8x256xf32, #tpu.memory_space<vmem>>, vector<8x256xf32>
    %1 = arith.negf %0 : vector<8x256xf32>
    %2 = math.exp %1 : vector<8x256xf32>
    %cst = arith.constant 1.000000e+00 : f32
    %3 = vector.broadcast %cst : f32 to vector<8x256xf32>
    %4 = arith.addf %3, %2 : vector<8x256xf32>
    %5 = arith.divf %3, %4 : vector<8x256xf32>
    %c0_1 = arith.constant 0 : index
    %c0_2 = arith.constant 0 : index
    %6 = vector.load %arg3[%c0_1, %c0_2] : memref<8x256xf32, #tpu.memory_space<vmem>>, vector<8x256xf32>
    %7 = arith.mulf %5, %6 : vector<8x256xf32>
    %8 = arith.mulf %5, %5 : vector<8x256xf32>
    %9 = arith.mulf %6, %6 : vector<8x256xf32>
    %10 = arith.addf %8, %9 : vector<8x256xf32>
    %cst_3 = arith.constant dense<0.000000e+00> : vector<8xf32>
    %11 = vector.multi_reduction <add>, %7, %cst_3 [1] : vector<8x256xf32> to vector<8xf32>
    %12 = vector.shape_cast %11 : vector<8xf32> to vector<8x1xf32>
    %cst_4 = arith.constant dense<0.000000e+00> : vector<8xf32>
    %13 = vector.multi_reduction <add>, %10, %cst_4 [1] : vector<8x256xf32> to vector<8xf32>
    %14 = vector.shape_cast %13 : vector<8xf32> to vector<8x1xf32>
    %c0_i32 = arith.constant 0 : i32
    %15 = arith.cmpi eq, %arg1, %c0_i32 : i32
    %16 = arith.extui %15 : i1 to i32
    %c0_i32_5 = arith.constant 0 : i32
    %17 = arith.cmpi ne, %16, %c0_i32_5 : i32
    scf.if %17 {
      %c0_8 = arith.constant 0 : index
      %c0_9 = arith.constant 0 : index
      %21 = vector.load %arg4[%c0_8, %c0_9] : memref<8x2xf32, #tpu.memory_space<vmem>>, vector<8x1xf32>
      tpu.vector_store %arg4[%c0_8, %c0_9], %12 {strides = array<i32>} : memref<8x2xf32, #tpu.memory_space<vmem>>, vector<8x1xf32>,
      %c0_10 = arith.constant 0 : index
      %c1 = arith.constant 1 : index
      %22 = vector.load %arg4[%c0_10, %c1] : memref<8x2xf32, #tpu.memory_space<vmem>>, vector<8x1xf32>
      tpu.vector_store %arg4[%c0_10, %c1], %14 {strides = array<i32>} : memref<8x2xf32, #tpu.memory_space<vmem>>, vector<8x1xf32>,
    } else {
    }
    %c0_i32_6 = arith.constant 0 : i32
    %18 = arith.cmpi sgt, %arg1, %c0_i32_6 : i32
    %19 = arith.extui %18 : i1 to i32
    %c0_i32_7 = arith.constant 0 : i32
    %20 = arith.cmpi ne, %19, %c0_i32_7 : i32
    scf.if %20 {
      %c0_8 = arith.constant 0 : index
      %c0_9 = arith.constant 0 : index
      %21 = vector.load %arg4[%c0_8, %c0_9] : memref<8x2xf32, #tpu.memory_space<vmem>>, vector<8x1xf32>
      %22 = arith.addf %21, %12 : vector<8x1xf32>
      %c0_10 = arith.constant 0 : index
      %c0_11 = arith.constant 0 : index
      %23 = vector.load %arg4[%c0_10, %c0_11] : memref<8x2xf32, #tpu.memory_space<vmem>>, vector<8x1xf32>
      tpu.vector_store %arg4[%c0_10, %c0_11], %22 {strides = array<i32>} : memref<8x2xf32, #tpu.memory_space<vmem>>, vector<8x1xf32>,
      %c0_12 = arith.constant 0 : index
      %c1 = arith.constant 1 : index
      %24 = vector.load %arg4[%c0_12, %c1] : memref<8x2xf32, #tpu.memory_space<vmem>>, vector<8x1xf32>
      %25 = arith.addf %24, %14 : vector<8x1xf32>
      %c0_13 = arith.constant 0 : index
      %c1_14 = arith.constant 1 : index
      %26 = vector.load %arg4[%c0_13, %c1_14] : memref<8x2xf32, #tpu.memory_space<vmem>>, vector<8x1xf32>
      tpu.vector_store %arg4[%c0_13, %c1_14], %25 {strides = array<i32>} : memref<8x2xf32, #tpu.memory_space<vmem>>, vector<8x1xf32>,
    } else {
    }
    return
  }
  func.func @transform_0(%arg0: i32, %arg1: i32) -> (i32, i32) {
    %c0_i32 = arith.constant 0 : i32
    return %arg0, %arg1 : i32, i32
  }
  func.func @transform_1(%arg0: i32, %arg1: i32) -> (i32, i32) {
    %c0_i32 = arith.constant 0 : i32
    return %arg0, %arg1 : i32, i32
  }
  func.func @transform_2(%arg0: i32, %arg1: i32) -> (i32, i32) {
    %c0_i32 = arith.constant 0 : i32
    %c0_i32_0 = arith.constant 0 : i32
    return %arg0, %c0_i32 : i32, i32
  }
}

</mosaic_0001>

<bundles_post_ra>
// kernel: tpu_custom_call.1
= control target key start
LH: loop header
LB: loop body
LE: loop exit
PB: predicated region body
PF: predicated region fallthrough
CT: control target
= control target key end

     0   :  { %7 = vsyncpa [#allocation3], 0  ;;  %s198_s0 = inlined_call_operand.hbm [shape: f32[8,256], index: 0, kind: input, shape index: {}]   ;;  %s199_s1 = inlined_call_operand.hbm [shape: f32[8,256], index: 1, kind: input, shape index: {}]   ;;  %s200_s2 = inlined_call_operand.vmem [shape: f32[8,2], index: 2, kind: output, shape index: {}]  }
   0x1   :  { %8 = vsyncpa [#allocation5], 0  ;;  %s151_s9 = smov [#allocation2]   ;;  %s152_s11 = smov [#allocation4]  }
   0x2   :  { %s15_s10 = sshll.u32 %s151_s9, 4  ;;  %s25_s12 = sshll.u32 %s152_s11, 4  ;;  %s16_s10 = int_to_ptr.vmem [resolvable:$true] %s15_s10  ;;  %s26_s12 = int_to_ptr.vmem [resolvable:$true] %s25_s12 }
   0x3   :  { %s103_s15 = scalar_lea.hbm %s198_s0, 256 }
   0x4   :  { %p104_p0 = scmp.ne.s32.totalorder %s198_s0, %s103_s15  ;;  %p107_p1 = scmp.lt.u32.totalorder %s103_s15, %s198_s0 }
   0x6   :  { %p109_p2 = pnand %p107_p1, %p104_p0 }
   0x8   :  { %112 = shalt.err (!%p109_p2)
}
   0x9   :  { %s113_s20 = scalar_lea.vmem %s16_s10, 256  ;;  %p118_p4 = scmp.lt.s32.totalorder %s16_s10, %s16_s10 }
   0xa   :  { %p114_p3 = scmp.ne.s32.totalorder %s16_s10, %s113_s20  ;;  %p119_p5 = scmp.lt.s32.totalorder %s113_s20, %s113_s20 }
   0xc   :  { %p120_p6 = por %p119_p5, %p118_p4 }
   0xe   :  { %p121_p7 = pnand %p120_p6, %p114_p3 }
  0x10   :  { %124 = shalt.err (!%p121_p7)
}
  0x11   :  { %18 = dma.hbm_to_vmem [thread:$0]  %s198_s0, 256, %s16_s10, [#allocation3]  }
  0x12   :  { %s125_s25 = scalar_lea.hbm %s199_s1, 256 }
  0x13   :  { %p126_p8 = scmp.ne.s32.totalorder %s199_s1, %s125_s25  ;;  %p129_p9 = scmp.lt.u32.totalorder %s125_s25, %s199_s1 }
  0x15   :  { %p131_p10 = pnand %p129_p9, %p126_p8 }
  0x17   :  { %134 = shalt.err (!%p131_p10)
}
  0x18   :  { %s135_s30 = scalar_lea.vmem %s26_s12, 256  ;;  %p140_p12 = scmp.lt.s32.totalorder %s26_s12, %s26_s12 }
  0x19   :  { %p136_p11 = scmp.ne.s32.totalorder %s26_s12, %s135_s30  ;;  %p141_p13 = scmp.lt.s32.totalorder %s135_s30, %s135_s30 }
  0x1b   :  { %p142_p0 = por %p141_p13, %p140_p12 }
  0x1d   :  { %p143_p1 = pnand %p142_p0, %p136_p11 }
  0x1f   :  { %146 = shalt.err (!%p143_p1)
}
  0x20   :  { %28 = dma.hbm_to_vmem [thread:$0]  %s199_s1, 256, %s26_s12, [#allocation5]  }
  0x21   :  { %147 = dma.done.wait [#allocation3], 256  }
  0x22   :  { %148 = vsyncadd [#allocation3], 4294967040 }
  0x23   :  { %149 = dma.done.wait [#allocation5], 256  }
  0x24   :  { %150 = vsyncadd [#allocation5], 4294967040  ;;  %v35_v0 = vld [vmem:[#allocation2] sm:$0xff]  ;;  %v36_v1 = vld [vmem:[#allocation2 + $0x8] sm:$0xff]  ;;  %vm69_vm0 = vcmask 7168   ;;  %vm71_vm1 = vcmask 15368  }
  0x25   :  { %v91_v2 = vmul.f32 -1.442695, %v35_v0  ;;  %v92_v3 = vmul.f32 -1.442695, %v36_v1  ;;  %v49_v8 = vld [vmem:[#allocation4] sm:$0xff]  ;;  %v50_v9 = vld [vmem:[#allocation4 + $0x8] sm:$0xff] }
  0x26   :  { %v55_v10 = vmul.f32 %v49_v8, %v49_v8  ;;  %v56_v12 = vmul.f32 %v50_v9, %v50_v9 }
  0x27   :  { %95 = vpow2.f32 %v91_v2 }
  0x28   :  { %97 = vpow2.f32 %v92_v3 }
  0x31   :  { %v96_v4 = vpop.eup %95 }
  0x32   :  { %v98_v5 = vpop.eup %97  ;;  %v43_v6 = vadd.f32 1.0, %v96_v4 }
  0x33   :  { %v44_v7 = vadd.f32 1.0, %v98_v5 }
  0x34   :  { %99 = vrcp.f32 %v43_v6 }
  0x35   :  { %101 = vrcp.f32 %v44_v7 }
  0x3e   :  { %v100_v11 = vpop.eup %99 }
  0x3f   :  { %v102_v13 = vpop.eup %101  ;;  %v51_v14 = vmul.f32 %v100_v11, %v49_v8  ;;  %v53_v15 = vmul.f32 %v100_v11, %v100_v11 }
  0x40   :  { %v52_v16 = vmul.f32 %v102_v13, %v50_v9  ;;  %v54_v17 = vmul.f32 %v102_v13, %v102_v13 }
  0x41   :  { %v57_v18 = vadd.f32 %v55_v10, %v53_v15 }
  0x42   :  { %v59_v19 = vadd.f32 %v52_v16, %v51_v14  ;;  %v58_v20 = vadd.f32 %v56_v12, %v54_v17 }
  0x44   :  { %60 = vadd.xlane.f32.xlu0 %v59_v19  ;;  %v62_v21 = vadd.f32 %v58_v20, %v57_v18 }
  0x48   :  { %63 = vadd.xlane.f32.xlu0 %v62_v21 }
  0xd1   :  { %v61_v22 = vpop.xlane.xlu0 %60 }
  0xd2   :  { %70 = vst.msk [vmem:[%s200_s2] sm:$0xff] %vm69_vm0, %v61_v22 }
  0xd5   :  { %v64_v23 = vpop.xlane.xlu0 %63 }
  0xd6   :  { %72 = vst.msk [vmem:[%s200_s2] sm:$0xff] %vm71_vm1, %v64_v23 }
  0xd7   :  { %89 = vsyncpa [#allocation3], 1 }
  0xd8   :  { %90 = vsyncpa [#allocation5], 1 }

</bundles_post_ra>
